<compile_context>
chip_gen: v6e
topology: v6e:2x2x1
jax: 0.10.0
libtpu: 0.0.40
codegen_flags: <defaults>
</compile_context>

<pallas_src>
import math
from functools import partial

import numpy as np
import jax
import jax.numpy as jnp
from jax.experimental import pallas as pl
from jax.experimental.pallas import tpu as pltpu


def _round_up(x, m):
    return ((x + m - 1) // m) * m


def _derive_vmem_limit():
    # ~75% of physical VMEM, clamped to [32 MB, 100 MB]:
    #   v5e/v6e (128 MiB) -> ~96 MB, v7x (64 MiB) -> ~48 MB.
    cap = 128 * 1024 * 1024
    try:
        info = pltpu.get_tpu_info()
        cap = int(getattr(info, "vmem_capacity_bytes", cap) or cap)
    except Exception:
        pass
    return max(32 * 1024 * 1024, min(int(cap * 0.75), 100 * 1024 * 1024))


_VMEM_LIMIT = _derive_vmem_limit()


# ----------------------------------------------------------------------------
# in-kernel math helpers (traced inside Pallas bodies only)
# ----------------------------------------------------------------------------
def _erf_approx(z):
    # Abramowitz & Stegun 7.1.26 (max abs err ~1.5e-7).  exp + EUP reciprocal.
    a1, a2, a3, a4, a5 = (0.254829592, -0.284496736, 1.421413741,
                          -1.453152027, 1.061405429)
    pc = 0.3275911
    za = jnp.abs(z)
    t = pl.reciprocal(1.0 + pc * za, approx=True)
    poly = ((((a5 * t + a4) * t + a3) * t + a2) * t + a1) * t
    y = 1.0 - poly * jnp.exp(-za * za)
    return jnp.where(z >= 0.0, y, -y)


def _gelu_exact(x):
    # torch F.gelu default (erf form), via the approximation above.
    return 0.5 * x * (1.0 + _erf_approx(x * (1.0 / math.sqrt(2.0))))


def _layernorm(x, gamma, beta, eps):
    mu = jnp.mean(x, axis=-1, keepdims=True)
    xc = x - mu
    var = jnp.mean(xc * xc, axis=-1, keepdims=True)
    return xc * jax.lax.rsqrt(var + eps) * gamma + beta


# ----------------------------------------------------------------------------
# Pallas kernels
# ----------------------------------------------------------------------------
def _matmul_kernel(x_ref, w_ref, *rest, activation, has_bias):
    if has_bias:
        b_ref, o_ref, acc_ref = rest
    else:
        b_ref = None
        o_ref, acc_ref = rest

    @pl.when(pl.program_id(2) == 0)
    def _():
        acc_ref[...] = jnp.zeros_like(acc_ref)

    # bf16 x bf16 -> f32 accumulate (no per-step casts on the A operand).
    acc_ref[...] += jnp.dot(x_ref[...], w_ref[...],
                            preferred_element_type=jnp.float32)

    @pl.when(pl.program_id(2) == pl.num_programs(2) - 1)
    def _():
        acc = acc_ref[...]
        if has_bias:
            acc = acc + b_ref[...]
        if activation == "elu":           # ELU(alpha=1), overflow-safe exp
            acc = jnp.where(acc > 0.0, acc, jnp.exp(jnp.minimum(acc, 0.0)) - 1.0)
        o_ref[...] = acc.astype(o_ref.dtype)


def pallas_linear(x2d, w, b=None, activation=None, out_dtype=jnp.bfloat16):
    """(M,K) @ (K,N) [+ b] [ELU].  bf16 MXU operands, f32 accumulation.
    Tiled (M,N,K) grid; K is zero-padded to a multiple of tk when tiled so the
    reduction stays bounded and pipelined.  Ragged M/N handled by cdiv grid."""
    x2d = x2d.astype(jnp.bfloat16)
    w = w.astype(jnp.bfloat16)
    M, K = x2d.shape
    N = w.shape[1]
    tm = M if M <= 512 else 512
    tn = N if N <= 512 else 512
    if K > 512:
        tk = 512
        Kp = _round_up(K, tk)
        if Kp != K:
            # zero pad along K (contributes nothing to the accumulation)
            x2d = jnp.pad(x2d, ((0, 0), (0, Kp - K)))
            w = jnp.pad(w, ((0, Kp - K), (0, 0)))
            K = Kp
    else:
        tk = K
    grid = (pl.cdiv(M, tm), pl.cdiv(N, tn), pl.cdiv(K, tk))

    has_bias = b is not None
    in_specs = [pl.BlockSpec((tm, tk), lambda i, j, k: (i, k)),
                pl.BlockSpec((tk, tn), lambda i, j, k: (k, j))]
    args = [x2d, w]
    if has_bias:
        in_specs.append(pl.BlockSpec((1, tn), lambda i, j, k: (0, j)))
        args.append(jnp.asarray(b, jnp.float32).reshape(1, N))

    return pl.pallas_call(
        partial(_matmul_kernel, activation=activation, has_bias=has_bias),
        out_shape=jax.ShapeDtypeStruct((M, N), out_dtype),
        grid=grid,
        in_specs=in_specs,
        out_specs=pl.BlockSpec((tm, tn), lambda i, j, k: (i, j)),
        scratch_shapes=[pltpu.VMEM((tm, tn), jnp.float32)],
        compiler_params=pltpu.CompilerParams(
            dimension_semantics=("parallel", "parallel", "arbitrary"),
            vmem_limit_bytes=_VMEM_LIMIT),
    )(*args)


def _layernorm_kernel(x_ref, g_ref, b_ref, o_ref, *, eps):
    o_ref[...] = _layernorm(x_ref[...].astype(jnp.float32),
                            g_ref[...], b_ref[...], eps).astype(o_ref.dtype)


def pallas_layernorm(x2d, gamma, beta, eps, out_dtype=jnp.bfloat16):
    x2d = x2d.astype(jnp.bfloat16)
    M, D = x2d.shape
    tm = M if M <= 1024 else 1024
    return pl.pallas_call(
        partial(_layernorm_kernel, eps=eps),
        out_shape=jax.ShapeDtypeStruct((M, D), out_dtype),
        grid=(pl.cdiv(M, tm),),
        in_specs=[pl.BlockSpec((tm, D), lambda i: (i, 0)),
                  pl.BlockSpec((1, D), lambda i: (0, 0)),
                  pl.BlockSpec((1, D), lambda i: (0, 0))],
        out_specs=pl.BlockSpec((tm, D), lambda i: (i, 0)),
        compiler_params=pltpu.CompilerParams(
            dimension_semantics=("parallel",), vmem_limit_bytes=_VMEM_LIMIT),
    )(x2d, gamma.reshape(1, D).astype(jnp.float32),
      beta.reshape(1, D).astype(jnp.float32))


def _linear_ln_kernel(x_ref, w_ref, b_ref, g_ref, bb_ref, o_ref, *, eps):
    """x @ W + b -> LayerNorm (single-tile K/N; used for the small bottleneck
    up-projection so the LN never leaves VMEM)."""
    y = jnp.dot(x_ref[...], w_ref[...],
                preferred_element_type=jnp.float32) + b_ref[...]
    o_ref[...] = _layernorm(y, g_ref[...], bb_ref[...], eps).astype(o_ref.dtype)


def pallas_linear_ln(x2d, w, b, gamma, beta, eps, out_dtype=jnp.bfloat16):
    x2d = x2d.astype(jnp.bfloat16)
    w = w.astype(jnp.bfloat16)
    M, K = x2d.shape
    N = w.shape[1]
    tm = M if M <= 512 else 512
    return pl.pallas_call(
        partial(_linear_ln_kernel, eps=eps),
        out_shape=jax.ShapeDtypeStruct((M, N), out_dtype),
        grid=(pl.cdiv(M, tm),),
        in_specs=[pl.BlockSpec((tm, K), lambda i: (i, 0)),
                  pl.BlockSpec((K, N), lambda i: (0, 0)),      # resident
                  pl.BlockSpec((1, N), lambda i: (0, 0)),
                  pl.BlockSpec((1, N), lambda i: (0, 0)),
                  pl.BlockSpec((1, N), lambda i: (0, 0))],
        out_specs=pl.BlockSpec((tm, N), lambda i: (i, 0)),
        compiler_params=pltpu.CompilerParams(
            dimension_semantics=("parallel",), vmem_limit_bytes=_VMEM_LIMIT),
    )(x2d, w, jnp.asarray(b, jnp.float32).reshape(1, N),
      gamma.reshape(1, N).astype(jnp.float32),
      beta.reshape(1, N).astype(jnp.float32))


def _attn_block_kernel(x_ref, q_ref, k_ref, v_ref, bias_ref, wo_ref,
                       g_ref, b_ref, o_ref, acc_ref, *, n_head, dk_p, dv_p, eps):
    """Masked softmax attention for one (batch, query-block) grid point:
    per-head scores + softmax + @V + output projection (accumulated in a VMEM
    scratch), residual add, LayerNorm.  Head slices are 128-lane aligned
    (dk_p/dv_p multiples of 128); 1/sqrt(d_k) already folded into Wq."""
    acc_ref[...] = jnp.zeros_like(acc_ref)
    bias = bias_ref[...].astype(jnp.float32)                     # (tq, N)

    # TODO(synk): for very large n_head switch to lax.fori_loop with pl.ds +
    # pl.multiple_of slice starts to bound live ranges further.
    for h in range(n_head):                                      # static, aligned views
        q = q_ref[0, :, h * dk_p:(h + 1) * dk_p]                 # (tq, dk_p) bf16
        k = k_ref[0, :, h * dk_p:(h + 1) * dk_p]                 # (N,  dk_p) bf16
        v = v_ref[0, :, h * dv_p:(h + 1) * dv_p]                 # (N,  dv_p) bf16
        s = jax.lax.dot_general(q, k, (((1,), (1,)), ((), ())),
                                preferred_element_type=jnp.float32)   # (tq, N)
        s = s + bias
        s = s - jnp.max(s, axis=-1, keepdims=True)
        p = jnp.exp(s)
        p = p * pl.reciprocal(jnp.sum(p, axis=-1, keepdims=True), approx=True)
        head = jnp.dot(p.astype(jnp.bfloat16), v,
                       preferred_element_type=jnp.float32)       # (tq, dv_p)
        # concat(heads) @ Wo  ==  sum_h head_h @ Wo[h*dv_p:(h+1)*dv_p, :]
        acc_ref[...] += jnp.dot(head.astype(jnp.bfloat16),
                                wo_ref[h * dv_p:(h + 1) * dv_p, :],
                                preferred_element_type=jnp.float32)

    y = acc_ref[...] + x_ref[0].astype(jnp.float32)              # residual
    o_ref[0] = _layernorm(y, g_ref[...], b_ref[...], eps).astype(o_ref.dtype)


def pallas_attention_block(x, q, k, v, attn_bias, wo_p, gamma, beta,
                           n_head, dk_p, dv_p, eps):
    """Grid (B, num_q_blocks); K/V + Wo resident per batch element; bias only
    ever DMA'd as a (tq, N) bf16 slab.  Both axes parallel (megacore)."""
    B, N, d_model = x.shape
    Hdk_p = n_head * dk_p
    Hdv_p = n_head * dv_p
    tq = N if N <= 256 else 256
    nq = pl.cdiv(N, tq)
    return pl.pallas_call(
        partial(_attn_block_kernel, n_head=n_head, dk_p=dk_p, dv_p=dv_p, eps=eps),
        out_shape=jax.ShapeDtypeStruct((B, N, d_model), jnp.bfloat16),
        grid=(B, nq),
        in_specs=[
            pl.BlockSpec((1, tq, d_model), lambda b, qi: (b, qi, 0)),   # residual
            pl.BlockSpec((1, tq, Hdk_p), lambda b, qi: (b, qi, 0)),     # Q block
            pl.BlockSpec((1, N, Hdk_p), lambda b, qi: (b, 0, 0)),       # K full
            pl.BlockSpec((1, N, Hdv_p), lambda b, qi: (b, 0, 0)),       # V full
            pl.BlockSpec((tq, N), lambda b, qi: (qi, 0)),               # bias slab
            pl.BlockSpec((Hdv_p, d_model), lambda b, qi: (0, 0)),       # Wo resident
            pl.BlockSpec((1, d_model), lambda b, qi: (0, 0)),
            pl.BlockSpec((1, d_model), lambda b, qi: (0, 0)),
        ],
        out_specs=pl.BlockSpec((1, tq, d_model), lambda b, qi: (b, qi, 0)),
        scratch_shapes=[pltpu.VMEM((tq, d_model), jnp.float32)],
        compiler_params=pltpu.CompilerParams(
            dimension_semantics=("parallel", "parallel"),
            vmem_limit_bytes=_VMEM_LIMIT),
    )(x.astype(jnp.bfloat16), q.astype(jnp.bfloat16), k.astype(jnp.bfloat16),
      v.astype(jnp.bfloat16), attn_bias.astype(jnp.bfloat16),
      wo_p.astype(jnp.bfloat16),
      gamma.reshape(1, d_model).astype(jnp.float32),
      beta.reshape(1, d_model).astype(jnp.float32))


def _ffn_block_kernel(x_ref, w1_ref, b1_ref, w2_ref, b2_ref, g_ref, b_ref,
                      o_ref, *, eps):
    x = x_ref[...]                                                # (tm, d_model) bf16
    h = jnp.dot(x, w1_ref[...], preferred_element_type=jnp.float32) + b1_ref[...]
    h = _gelu_exact(h)
    y = (jnp.dot(h.astype(jnp.bfloat16), w2_ref[...],
                 preferred_element_type=jnp.float32)
         + b2_ref[...] + x.astype(jnp.float32))
    o_ref[...] = _layernorm(y, g_ref[...], b_ref[...], eps).astype(o_ref.dtype)


def pallas_ffn_block(x2d, w1, b1, w2, b2, gamma, beta, eps):
    """Fused x@W1+b1 -> GELU -> @W2+b2 -> +residual -> LayerNorm, bf16 I/O.
    tm capped at 256 to keep the (tm, d_inner) f32 intermediate + resident
    W1/W2 within v7x's 64 MiB VMEM."""
    # TODO(synk): for very large d_inner, tile d_inner with an inner
    # accumulation loop (pltpu.emit_pipeline) instead of resident W1/W2.
    x2d = x2d.astype(jnp.bfloat16)
    M, d_model = x2d.shape
    d_inner = w1.shape[1]
    tm = M if M <= 256 else 256
    return pl.pallas_call(
        partial(_ffn_block_kernel, eps=eps),
        out_shape=jax.ShapeDtypeStruct((M, d_model), jnp.bfloat16),
        grid=(pl.cdiv(M, tm),),
        in_specs=[
            pl.BlockSpec((tm, d_model), lambda i: (i, 0)),
            pl.BlockSpec((d_model, d_inner), lambda i: (0, 0)),    # resident
            pl.BlockSpec((1, d_inner), lambda i: (0, 0)),
            pl.BlockSpec((d_inner, d_model), lambda i: (0, 0)),
            pl.BlockSpec((1, d_model), lambda i: (0, 0)),
            pl.BlockSpec((1, d_model), lambda i: (0, 0)),
            pl.BlockSpec((1, d_model), lambda i: (0, 0)),
        ],
        out_specs=pl.BlockSpec((tm, d_model), lambda i: (i, 0)),
        compiler_params=pltpu.CompilerParams(
            dimension_semantics=("parallel",), vmem_limit_bytes=_VMEM_LIMIT),
    )(x2d, w1.astype(jnp.bfloat16),
      jnp.asarray(b1, jnp.float32).reshape(1, d_inner),
      w2.astype(jnp.bfloat16), jnp.asarray(b2, jnp.float32).reshape(1, d_model),
      gamma.reshape(1, d_model).astype(jnp.float32),
      beta.reshape(1, d_model).astype(jnp.float32))


# ----------------------------------------------------------------------------
# Model setup (pure numpy / JAX glue)
# ----------------------------------------------------------------------------
def get_mask(seq_size, ary, inner_size):
    """Pyraformer PAM mask.  Pyramid sizes are rounded up so each level divides
    evenly by `ary` (hence rf_size = all_size[0] >= seq_size, left padding)."""
    effe_size = [seq_size]
    while effe_size[-1] > 1:
        effe_size.append(int(math.ceil(effe_size[-1] / ary)))
    depth = len(effe_size)
    all_size = [effe_size[-1]]
    for _ in range(depth - 1):
        all_size.insert(0, all_size[0] * ary)
    n = sum(all_size)
    starts = np.cumsum([0] + all_size)
    allow = np.zeros((n, n), dtype=np.float32)
    half = inner_size // 2
    for lvl in range(depth):
        s = starts[lvl]
        for i in range(all_size[lvl]):
            lo = max(i - half, 0)
            hi = min(i + half + 1, all_size[lvl])
            allow[s + i, s + lo:s + hi] = 1.0
    for lvl in range(depth - 1):
        s, sp = starts[lvl], starts[lvl + 1]
        for i in range(all_size[lvl]):
            p = i // ary
            allow[s + i, sp + p] = 1.0
            allow[sp + p, s + i] = 1.0
    mask = 1.0 - allow          # 1.0 where attention is blocked
    return jnp.asarray(mask, jnp.float32), all_size, effe_size


def positional_embedding(length, d_model):
    pe = np.zeros((length, d_model), dtype=np.float32)
    pos = np.arange(0, length, dtype=np.float32)[:, None]
    div = np.exp(np.arange(0, d_model, 2, dtype=np.float32)
                 * -(math.log(10000.0) / d_model))
    pe[:, 0::2] = np.sin(pos * div)
    pe[:, 1::2] = np.cos(pos * div)
    return jnp.asarray(pe)


def _pack_heads_cols(w, n_head, d_small, d_pad):
    """(d_model, n_head*d_small) -> (d_model, n_head*d_pad) with zero lane pad
    so each head's block starts at a multiple of 128 lanes."""
    dm = w.shape[0]
    w = w.reshape(dm, n_head, d_small)
    w = jnp.pad(w, ((0, 0), (0, 0), (0, d_pad - d_small)))
    return w.reshape(dm, n_head * d_pad)


def pack_mha_weights(wq, wk, wv, wo, n_head, d_k, d_v, dk_p, dv_p):
    """Build the lane-aligned packed [Q|K|V] projection (1/sqrt(d_k) folded
    into the Q columns) and the row-padded output projection."""
    scale = 1.0 / math.sqrt(d_k)
    wqkv_p = jnp.concatenate([
        _pack_heads_cols(wq * scale, n_head, d_k, dk_p),
        _pack_heads_cols(wk, n_head, d_k, dk_p),
        _pack_heads_cols(wv, n_head, d_v, dv_p),
    ], axis=1)
    dm = wo.shape[1]
    wo_p = jnp.pad(wo.reshape(n_head, d_v, dm),
                   ((0, 0), (0, dv_p - d_v), (0, 0))).reshape(n_head * dv_p, dm)
    return wqkv_p, wo_p


def init_params(key, cfg, depth):
    keys = iter(jax.random.split(key, 128))

    def w(shape, fan_in):
        return jax.random.normal(next(keys), shape, jnp.float32) / math.sqrt(fan_in)

    dm, dk, dv, dh = cfg["d_model"], cfg["d_k"], cfg["d_v"], cfg["d_inner"]
    nh, cin, ary = cfg["n_head"], cfg["input_size"], cfg["ary"]
    dk_p, dv_p = cfg["dk_p"], cfg["dv_p"]

    params = {
        "emb": {
            "tok_w": w((dm, cin, 3), cin * 3),              # Conv1d(c_in, d_model, 3)
            "pos": positional_embedding(cfg["seq_size"], dm),
        },
        "bott": {
            "down_w": w((dm, dk), dm), "down_b": jnp.zeros((dk,), jnp.float32),
            "conv_w": [w((dk, dk, ary), dk * ary) for _ in range(depth - 1)],
            "conv_b": [jnp.zeros((dk,), jnp.float32) for _ in range(depth - 1)],
            "up_w": w((dk, dm), dk), "up_b": jnp.zeros((dm,), jnp.float32),
            "norm_g": jnp.ones((dm,), jnp.float32),
            "norm_b": jnp.zeros((dm,), jnp.float32),
        },
        "layers": [],
        "rec_w": w((dm, cin), dm),
        "rec_b": jnp.zeros((cin,), jnp.float32),
    }
    for _ in range(cfg["n_layer"]):
        wq = w((dm, nh * dk), dm)
        wk = w((dm, nh * dk), dm)
        wv = w((dm, nh * dv), dm)
        wo = w((nh * dv, dm), nh * dv)
        wqkv_p, wo_p = pack_mha_weights(wq, wk, wv, wo, nh, dk, dv, dk_p, dv_p)
        params["layers"].append({
            "wqkv_p": wqkv_p, "wo_p": wo_p,
            "ln1_g": jnp.ones((dm,), jnp.float32), "ln1_b": jnp.zeros((dm,), jnp.float32),
            "w1": w((dm, dh), dm), "b1": jnp.zeros((dh,), jnp.float32),
            "w2": w((dh, dm), dh), "b2": jnp.zeros((dm,), jnp.float32),
            "ln2_g": jnp.ones((dm,), jnp.float32), "ln2_b": jnp.zeros((dm,), jnp.float32),
        })
    return params


# ----------------------------------------------------------------------------
# Forward pass (glue in JAX, compute in Pallas)
# ----------------------------------------------------------------------------
def token_embedding(x, w_conv):
    """Conv1d(c_in, d_model, k=3, pad=1 circular, bias=False) as im2col+matmul."""
    B, L, C = x.shape
    x = x.astype(jnp.bfloat16)
    xp = jnp.concatenate([x[:, -1:, :], x, x[:, :1, :]], axis=1)  # circular pad
    win = jnp.stack([xp[:, 0:L, :], xp[:, 1:L + 1, :], xp[:, 2:L + 2, :]], axis=2)
    x2 = win.reshape(B * L, 3 * C)
    d_model = w_conv.shape[0]
    w2 = jnp.transpose(w_conv, (2, 1, 0)).reshape(3 * C, d_model)  # ((j,ci), co)
    out = pallas_linear(x2, w2)                                    # bias-free, bf16
    return out.reshape(B, L, d_model)


def data_embedding(x, p):
    val = token_embedding(x, p["tok_w"])
    pos = p["pos"][None, :x.shape[1], :].astype(jnp.bfloat16)
    return val + pos                                  # dropout == identity (eval)


def bottleneck_construct(enc_input, p, ary):
    B, L0, d_model = enc_input.shape
    d_k = p["down_w"].shape[1]
    cur = pallas_linear(enc_input.reshape(B * L0, d_model),
                        p["down_w"], p["down_b"]).reshape(B, L0, d_k)
    bn_scale = 1.0 / math.sqrt(1.0 + 1e-5)  # eval BatchNorm1d, default running stats
    outs = []
    # TODO(synk): the tiny per-level conv matmuls are separate launches; they
    # could be fused into one sequential in-kernel loop if launch overhead
    # ever dominates at pyramid-level sizes.
    for wc, bc in zip(p["conv_w"], p["conv_b"]):
        Bc, Lc, Cc = cur.shape
        Lo = Lc // ary
        x2 = cur[:, :Lo * ary, :].reshape(Bc * Lo, ary * Cc)
        w2 = jnp.transpose(wc, (2, 1, 0)).reshape(ary * Cc, Cc) * bn_scale
        y = pallas_linear(x2, w2, bc * bn_scale, activation="elu").reshape(Bc, Lo, Cc)
        outs.append(y)
        cur = y
    coarse = jnp.concatenate(outs, axis=1)                          # (B, sum L>0, d_k)
    # LN(concat([enc, up])) == concat(LN(enc), LN(up)) row-wise, so fuse the LN
    # into the up-projection epilogue and run a plain LN on the enc rows.
    up_ln = pallas_linear_ln(coarse.reshape(-1, d_k), p["up_w"], p["up_b"],
                             p["norm_g"], p["norm_b"], 1e-5)
    up_ln = up_ln.reshape(B, -1, d_model)
    enc_ln = pallas_layernorm(enc_input.reshape(-1, d_model),
                              p["norm_g"], p["norm_b"], 1e-5)
    enc_ln = enc_ln.reshape(B, L0, d_model)
    return jnp.concatenate([enc_ln, up_ln], axis=1)                 # (B, N, d_model)


def encoder_layer(x, attn_bias, lp, n_head, dk_p, dv_p):
    B, N, d_model = x.shape
    # QKV projection via the tiled matmul (bf16 in / bf16 out).
    qkv = pallas_linear(x.reshape(B * N, d_model), lp["wqkv_p"])
    qkv = qkv.reshape(B, N, -1)
    Hdk_p = n_head * dk_p
    q = qkv[..., :Hdk_p]
    k = qkv[..., Hdk_p:2 * Hdk_p]
    v = qkv[..., 2 * Hdk_p:]
    # fused: masked attention + out proj + residual + LayerNorm (post-norm)
    x = pallas_attention_block(x, q, k, v, attn_bias, lp["wo_p"],
                               lp["ln1_g"], lp["ln1_b"], n_head, dk_p, dv_p, 1e-6)
    # fused: W1 + GELU + W2 + residual + LayerNorm (post-norm)
    y = pallas_ffn_block(x.reshape(B * N, d_model), lp["w1"], lp["b1"],
                         lp["w2"], lp["b2"], lp["ln2_g"], lp["ln2_b"], 1e-6)
    return y.reshape(B, N, d_model)


def pyra_ae_forward(x, params, cfg, mask, all_size):
    seq_enc = data_embedding(x, params["emb"])                      # (B, seq, d_model)
    rf_size = all_size[0]
    pad = rf_size - seq_enc.shape[1]
    # TODO(synk): the padding_size==0 branch of the reference leaves seq_enc
    # transposed (upstream shape quirk); only the padded path is implemented.
    if pad > 0:
        seq_enc = jnp.pad(seq_enc, ((0, 0), (pad, 0), (0, 0)))
    seq_enc = bottleneck_construct(seq_enc, params["bott"], cfg["ary"])
    # single (N, N) additive bias shared by every (batch, head); -1e9 == blocked.
    # Stored bf16 and only ever streamed into VMEM as (tq, N) slabs.
    attn_bias = (mask * jnp.float32(-1e9)).astype(jnp.bfloat16)
    # TODO(synk): for production, pad d_model / d_inner to multiples of 128 so
    # all output tiles are lane-dense (unmasked vst).
    for lp in params["layers"]:
        seq_enc = encoder_layer(seq_enc, attn_bias, lp,
                                cfg["n_head"], cfg["dk_p"], cfg["dv_p"])
    seq_enc = seq_enc[:, :cfg["seq_size"]]
    Bs, S, D = seq_enc.shape
    rec = pallas_linear(seq_enc.reshape(Bs * S, D), params["rec_w"],
                        params["rec_b"], out_dtype=jnp.float32)
    return rec.reshape(Bs, S, cfg["input_size"])


# ----------------------------------------------------------------------------
if __name__ == "__main__":
    cfg = dict(input_size=4, seq_size=6, ary=2, inner=3, d_model=32,
               n_layer=2, n_head=2, d_k=16, d_v=16, d_inner=64)
    cfg["dk_p"] = _round_up(cfg["d_k"], 128)    # lane-aligned per-head strides
    cfg["dv_p"] = _round_up(cfg["d_v"], 128)

    mask, all_size, effe_size = get_mask(cfg["seq_size"], cfg["ary"], cfg["inner"])
    depth = len(all_size)

    key = jax.random.PRNGKey(0)
    k_param, k_x = jax.random.split(key)
    params = init_params(k_param, cfg, depth)

    x = jax.random.normal(k_x, (2, cfg["seq_size"], cfg["input_size"]), jnp.float32)

    out = pyra_ae_forward(x, params, cfg, mask, all_size)
    out = jax.block_until_ready(out)
    assert out.shape == (2, cfg["seq_size"], cfg["input_size"])
    assert bool(jnp.all(jnp.isfinite(out)))
    print("KERNEL_OK")
</pallas_src>

<mosaic_0001>
module attributes {stable_mosaic.version = 11 : i64} {
  func.func @_matmul_kernel(%arg0: i32, %arg1: i32, %arg2: i32, %arg3: memref<12x12xbf16, #tpu.memory_space<vmem>>, %arg4: memref<12x32xbf16, #tpu.memory_space<vmem>>, %arg5: memref<12x32xbf16, #tpu.memory_space<vmem>>, %arg6: memref<12x32xf32, #tpu.memory_space<vmem>>) attributes {dimension_semantics = [#tpu.dimension_semantics<parallel>, #tpu.dimension_semantics<parallel>, #tpu.dimension_semantics<arbitrary>], iteration_bounds = array<i64: 1, 1, 1>, scalar_prefetch = 0 : i64, scratch_operands = 1 : i64, tpu.core_type = #tpu.core_type<tc>, window_params = [{transform_indices = @transform_0, window_bounds = array<i64: 12, 12>}, {transform_indices = @transform_1, window_bounds = array<i64: 12, 32>}, {transform_indices = @transform_2, window_bounds = array<i64: 12, 32>}]} {
    %c0_i32 = arith.constant 0 : i32
    %0 = arith.cmpi eq, %arg2, %c0_i32 : i32
    %1 = arith.extui %0 : i1 to i32
    %c0_i32_0 = arith.constant 0 : i32
    %2 = arith.cmpi ne, %1, %c0_i32_0 : i32
    scf.if %2 {
      %cst_10 = arith.constant 0.000000e+00 : f32
      %12 = vector.broadcast %cst_10 : f32 to vector<12x32xf32>
      %c0_11 = arith.constant 0 : index
      %c0_12 = arith.constant 0 : index
      %13 = vector.load %arg6[%c0_11, %c0_12] : memref<12x32xf32, #tpu.memory_space<vmem>>, vector<12x32xf32>
      tpu.vector_store %arg6[%c0_11, %c0_12], %12 {strides = array<i32>} : memref<12x32xf32, #tpu.memory_space<vmem>>, vector<12x32xf32>,
    } else {
    }
    %c0 = arith.constant 0 : index
    %c0_1 = arith.constant 0 : index
    %3 = vector.load %arg6[%c0, %c0_1] : memref<12x32xf32, #tpu.memory_space<vmem>>, vector<12x32xf32>
    %c0_2 = arith.constant 0 : index
    %c0_3 = arith.constant 0 : index
    %4 = vector.load %arg3[%c0_2, %c0_3] : memref<12x12xbf16, #tpu.memory_space<vmem>>, vector<12x12xbf16>
    %c0_4 = arith.constant 0 : index
    %c0_5 = arith.constant 0 : index
    %5 = vector.load %arg4[%c0_4, %c0_5] : memref<12x32xbf16, #tpu.memory_space<vmem>>, vector<12x32xbf16>
    %cst = arith.constant dense<0.000000e+00> : vector<12x32xf32>
    %6 = tpu.matmul %4, %5, %cst {dimension_numbers = #tpu.dot_dimension_numbers<[1], [0], [0], [1], [0, 0, 1, 1], [], []>} : vector<12x12xbf16>, vector<12x32xbf16>, vector<12x32xf32> -> vector<12x32xf32>
    %7 = arith.addf %3, %6 : vector<12x32xf32>
    %c0_6 = arith.constant 0 : index
    %c0_7 = arith.constant 0 : index
    %8 = vector.load %arg6[%c0_6, %c0_7] : memref<12x32xf32, #tpu.memory_space<vmem>>, vector<12x32xf32>
    tpu.vector_store %arg6[%c0_6, %c0_7], %7 {strides = array<i32>} : memref<12x32xf32, #tpu.memory_space<vmem>>, vector<12x32xf32>,
    %c0_i32_8 = arith.constant 0 : i32
    %9 = arith.cmpi eq, %arg2, %c0_i32_8 : i32
    %10 = arith.extui %9 : i1 to i32
    %c0_i32_9 = arith.constant 0 : i32
    %11 = arith.cmpi ne, %10, %c0_i32_9 : i32
    scf.if %11 {
      %c0_10 = arith.constant 0 : index
      %c0_11 = arith.constant 0 : index
      %12 = vector.load %arg6[%c0_10, %c0_11] : memref<12x32xf32, #tpu.memory_space<vmem>>, vector<12x32xf32>
      %13 = arith.truncf %12 : vector<12x32xf32> to vector<12x32xbf16>
      %c0_12 = arith.constant 0 : index
      %c0_13 = arith.constant 0 : index
      %14 = vector.load %arg5[%c0_12, %c0_13] : memref<12x32xbf16, #tpu.memory_space<vmem>>, vector<12x32xbf16>
      tpu.vector_store %arg5[%c0_12, %c0_13], %13 {strides = array<i32>} : memref<12x32xbf16, #tpu.memory_space<vmem>>, vector<12x32xbf16>,
    } else {
    }
    return
  }
  func.func @transform_0(%arg0: i32, %arg1: i32, %arg2: i32) -> (i32, i32) {
    %c0_i32 = arith.constant 0 : i32
    return %arg0, %arg2 : i32, i32
  }
  func.func @transform_1(%arg0: i32, %arg1: i32, %arg2: i32) -> (i32, i32) {
    %c0_i32 = arith.constant 0 : i32
    return %arg2, %arg1 : i32, i32
  }
  func.func @transform_2(%arg0: i32, %arg1: i32, %arg2: i32) -> (i32, i32) {
    %c0_i32 = arith.constant 0 : i32
    return %arg0, %arg1 : i32, i32
  }
}

</mosaic_0001>

<bundles_post_ra>
// kernel: tpu_custom_call.1
= control target key start
LH: loop header
LB: loop body
LE: loop exit
PB: predicated region body
PF: predicated region fallthrough
CT: control target
= control target key end

     0   :  { %7 = vsyncpa [#allocation4], 0  ;;  %s289_s0 = inlined_call_operand.hbm [shape: bf16[12,12], index: 0, kind: input, shape index: {}]   ;;  %s290_s1 = inlined_call_operand.hbm [shape: bf16[12,32], index: 1, kind: input, shape index: {}]   ;;  %s291_s2 = inlined_call_operand.hbm [shape: bf16[12,32], index: 2, kind: output, shape index: {}]  }
   0x1   :  { %8 = vsyncpa [#allocation7], 0 }
   0x2   :  { %9 = vsyncpa [#allocation5], 0  ;;  %s244_s9 = smov [#allocation3]  }
   0x3   :  { %s15_s10 = sshll.u32 %s244_s9, 4  ;;  %s16_s10 = int_to_ptr.vmem [resolvable:$true] %s15_s10 }
   0x4   :  { %s186_s11 = scalar_lea.vmem %s16_s10, 128  ;;  %p191_p1 = scmp.lt.s32.totalorder %s16_s10, %s16_s10 }
   0x5   :  { %p187_p0 = scmp.ne.s32.totalorder %s16_s10, %s186_s11  ;;  %p192_p2 = scmp.lt.s32.totalorder %s186_s11, %s186_s11 }
   0x7   :  { %p193_p3 = por %p192_p2, %p191_p1 }
   0x9   :  { %p194_p4 = pnand %p193_p3, %p187_p0 }
   0xb   :  { %197 = shalt.err (!%p194_p4)
}
   0xc   :  { %s245_s12 = smov 64   ;;  %s246_s13 = smov 4  }
   0xd   :  { %21 = dma.hbm_to_vmem [thread:$0]  %s289_s0, 128, %s16_s10, [#allocation4], %s245_s12, %s245_s12, %s246_s13  }
   0xe   :  { %s247_s16 = smov [#allocation6]  }
   0xf   :  { %s27_s17 = sshll.u32 %s247_s16, 4  ;;  %s28_s17 = int_to_ptr.vmem [resolvable:$true] %s27_s17 }
  0x10   :  { %s206_s18 = scalar_lea.vmem %s28_s17, 128  ;;  %p211_p6 = scmp.lt.s32.totalorder %s28_s17, %s28_s17 }
  0x11   :  { %p207_p5 = scmp.ne.s32.totalorder %s28_s17, %s206_s18  ;;  %p212_p7 = scmp.lt.s32.totalorder %s206_s18, %s206_s18 }
  0x13   :  { %p213_p8 = por %p212_p7, %p211_p6 }
  0x15   :  { %p214_p9 = pnand %p213_p8, %p207_p5 }
  0x17   :  { %217 = shalt.err (!%p214_p9)
}
  0x18   :  { %33 = dma.hbm_to_vmem [thread:$0]  %s290_s1, 128, %s28_s17, [#allocation7], %s245_s12, %s245_s12, %s246_s13  }
  0x19   :  { %238 = dma.done.wait [#allocation4], 128  }
  0x1a   :  { %239 = vsyncadd [#allocation4], 4294967168 }
  0x1b   :  { %240 = dma.done.wait [#allocation7], 128  }
  0x1c   :  { %241 = vsyncadd [#allocation7], 4294967168  ;;  %vm45_vm0 = vcmask 261120   ;;  %v248_v0 = vmov 0.0   ;;  %vm249_vm1 = vmmov 0   ;;  %vm69_vm2 = vcmask 1045504  }
  0x1d   :  { %46 = vst.msk [vmem:[#allocation2] sm:$0xff] %vm45_vm0, %v248_v0  ;;  %163 = vmatprep.subr.bf16.mxu0 %v248_v0  ;;  %165 = vmatprep.mubr.msk.bf16.mxu0 %vm249_vm1, %v248_v0  ;;  %v176_v1 = vld [vmem:[#allocation6] sm:$0x3f]   ;;  %v177_v3 = vld [vmem:[#allocation3] sm:$0x3f]   ;;  %vm65_vm3 = vcmask 97280  }
  0x1e   :  { %v71_v2 = vsel %vm69_vm2, %v176_v1, 0  ;;  %vm47_vm4 = vcmask 257024   ;;  %s250_s0 = smov [#allocation8]   ;;  %vm134_vm5 = vcmask 254976  }
  0x1f   :  { %164 = vmatpush3.bf16.msra.mxu0 %v71_v2  ;;  %48 = vst.msk [vmem:[#allocation2 + $0x8] sm:$0xf] %vm47_vm4, %v248_v0  ;;  %s141_s1 = sshll.u32 %s250_s0, 4  ;;  %s142_s1 = int_to_ptr.vmem [resolvable:$true] %s141_s1 }
  0x20   :  { %s218_s21 = scalar_lea.vmem %s142_s1, 128  ;;  %p223_p11 = scmp.lt.s32.totalorder %s142_s1, %s142_s1 }
  0x21   :  { %p219_p10 = scmp.ne.s32.totalorder %s142_s1, %s218_s21  ;;  %p224_p12 = scmp.lt.s32.totalorder %s218_s21, %s218_s21 }
  0x22   :  { %166 = vmatmul.mubr.msk.bf16.vlgmr.msra.gmra.mxu0 %vm65_vm3, %v177_v3 }
  0x23   :  { %p225_p13 = por %p224_p12, %p223_p11 }
  0x24   :  { %v49_v4 = vld [vmem:[#allocation2] sm:$0xff] }
  0x25   :  { %p226_p0 = pnand %p225_p13, %p219_p10 }
  0x26   :  { %v50_v8 = vld [vmem:[#allocation2 + $0x8] sm:$0xf] }
  0xe2   :  { %v107_v5 = vpop.f32.mrf.mxu0 }
  0xe3   :  { %v114_v6 = vadd.f32 %v107_v5, %v49_v4 }
  0xe4   :  { %v167_v7 = vpop.f32.mrf.mxu0 }
  0xe5   :  { %117 = vst.msk [vmem:[#allocation2] sm:$0xff] %vm45_vm0, %v114_v6 }
  0xe6   :  { %v110_v9 = vpop.f32.mrf.mxu0 }
  0xe7   :  { %v115_v10 = vadd.f32 %v110_v9, %v50_v8 }
  0xe8   :  { %v168_v11 = vpop.f32.mrf.mxu0 }
  0xe9   :  { %119 = vst.msk [vmem:[#allocation2 + $0x8] sm:$0xf] %vm47_vm4, %v115_v10 }
  0xec   :  { %v123_v12 = vld [vmem:[#allocation2] sm:$0xff] }
  0xed   :  { %v159_v13 = vpack.c.bf16 %v123_v12, %v123_v12 }
  0xef   :  { %133 = vst.msk [vmem:[#allocation8] sm:$0xf] %vm47_vm4, %v159_v13 }
  0xf0   :  { %v124_v14 = vld [vmem:[#allocation2 + $0x8] sm:$0xf] }
  0xf1   :  { %v160_v15 = vpack.c.bf16 %v124_v14, %v124_v14 }
  0xf3   :  { %135 = vst.msk [vmem:[#allocation8 + $0x4] sm:$0x3] %vm134_vm5, %v160_v15 }
  0xf4   :  { %229 = shalt.err (!%p226_p0)
}
  0xf5   :  { %147 = dma.vmem_to_hbm [thread:$0]  %s142_s1, 128, %s291_s2, [#allocation5], %s245_s12, %s245_s12, %s246_s13  }
  0xf6   :  { %242 = dma.done.wait [#allocation5], 128  }
  0xf7   :  { %243 = vsyncadd [#allocation5], 4294967168 }
  0xf8   :  { %151 = vsyncpa [#allocation4], 1 }
  0xf9   :  { %152 = vsyncpa [#allocation7], 1 }
  0xfa   :  { %153 = vsyncpa [#allocation5], 1 }

</bundles_post_ra>
